<compile_context>
chip_gen: v7x
topology: tpu7x:2x2x1
jax: 0.10.0
libtpu: 0.0.40
codegen_flags: <defaults>
</compile_context>

<pallas_src>
import jax
import jax.numpy as jnp
from jax.experimental import pallas as pl
from jax.experimental.pallas import tpu as pltpu


def _round_up(x, m):
    return (x + m - 1) // m * m


# ----------------------------------------------------------------------------
# Kernel: 3 matmuls, all lane-dense (lane = round_up(latent_dim, 128)).
# ----------------------------------------------------------------------------
def _fusion_kernel(xi_ref, xs_ref, w1i_ref, w1s_ref, w23_ref, b_ref, o_ref):
    b = b_ref[...]                                    # (3, lane)

    # layer 1: relu(xi @ W1i + xs @ W1s + b1)
    #   == concat(relu(instr layer-1), relu(state layer-1)) in cols [:latent]
    h = jnp.dot(xi_ref[...], w1i_ref[...], preferred_element_type=jnp.float32)
    h = h + jnp.dot(xs_ref[...], w1s_ref[...], preferred_element_type=jnp.float32)
    h = jnp.maximum(h + b[0:1, :], 0.0)

    # folded (block-diag layer-2 @ fusion layer-1), then ReLU
    f = jnp.dot(h, w23_ref[0], preferred_element_type=jnp.float32) + b[1:2, :]
    f = jnp.maximum(f, 0.0)

    # fusion layer-2
    o_ref[...] = (
        jnp.dot(f, w23_ref[1], preferred_element_type=jnp.float32) + b[2:3, :]
    ).astype(o_ref.dtype)


# ----------------------------------------------------------------------------
# Parameter packing (done once, outside the kernel).
# ----------------------------------------------------------------------------
def pack_params(p, instr_dim, state_dim, latent_dim):
    """Fold per-layer nn.Linear params into lane-dense slabs.

    Slabs (all zero outside the logical region, so padding is inert):
      w1i   : (instr_dim, lane)   cols [:half]        = wi1
      w1s   : (state_dim, lane)   cols [half:latent]  = ws1
      w23   : (2, lane, lane)     slot 0 = blockdiag(wi2, ws2) @ wf1  (exact fold)
                                  slot 1 = wf2
      b_slab: (3, lane)           row 0 = concat(bi1, bs1)
                                  row 1 = concat(bi2, bs2) @ wf1 + bf1
                                  row 2 = bf2
    """
    assert latent_dim % 2 == 0, "latent_dim must be even (latent_dim // 2 projections)"
    half = latent_dim // 2
    lane = _round_up(latent_dim, 128)                 # lane-dense feature width

    w1i = jnp.zeros((instr_dim, lane), jnp.float32).at[:, :half].set(p["wi1"])
    w1s = jnp.zeros((state_dim, lane), jnp.float32).at[:, half:latent_dim].set(p["ws1"])

    # exact algebraic fold of layer-2 (block-diag) into fusion layer-1
    w_bd2 = jnp.zeros((latent_dim, latent_dim), jnp.float32)
    w_bd2 = w_bd2.at[:half, :half].set(p["wi2"]).at[half:, half:].set(p["ws2"])
    b_bd2 = jnp.concatenate([p["bi2"], p["bs2"]], axis=-1)        # (1, latent)
    w_fold = w_bd2 @ p["wf1"]                                     # (latent, latent)
    b_fold = b_bd2 @ p["wf1"] + p["bf1"]                          # (1, latent)

    w23 = jnp.zeros((2, lane, lane), jnp.float32)
    w23 = w23.at[0, :latent_dim, :latent_dim].set(w_fold)
    w23 = w23.at[1, :latent_dim, :latent_dim].set(p["wf2"])

    b_slab = jnp.zeros((3, lane), jnp.float32)
    b_slab = b_slab.at[0, :latent_dim].set(
        jnp.concatenate([p["bi1"], p["bs1"]], axis=-1)[0])
    b_slab = b_slab.at[1, :latent_dim].set(b_fold[0])
    b_slab = b_slab.at[2, :latent_dim].set(p["bf2"][0])

    return dict(
        w1i=w1i, w1s=w1s, w23=w23, b_slab=b_slab,
        instr_dim=instr_dim, state_dim=state_dim, latent_dim=latent_dim, lane=lane,
    )


# ----------------------------------------------------------------------------
# Batch-tile selection from a VMEM budget (+ v7x two-TensorCore split).
# ----------------------------------------------------------------------------
def _choose_tile_b(batch, instr_dim, state_dim, lane, weight_bytes,
                   vmem_budget_bytes=24 * 1024 * 1024, max_tile=1024):
    # f32 activations + output, double-buffered by the Pallas pipeline.
    row_bytes = 2 * 4 * (instr_dim + state_dim + lane)
    avail = max(vmem_budget_bytes - 2 * weight_bytes, 1 << 20)
    cap = max(8, min(max_tile, (avail // row_bytes) // 8 * 8))
    batch8 = _round_up(batch, 8)
    if batch8 <= cap:
        if batch8 >= 64:
            # keep >=2 grid tiles so v7x's second TensorCore gets work
            return max(8, _round_up((batch8 + 1) // 2, 8))
        return batch8
    return cap


# ----------------------------------------------------------------------------
# Wrapper replicating DimensionAwareFusion.forward for well-formed inputs.
# ----------------------------------------------------------------------------
def dimension_aware_fusion(instr_emb, state_obs, packed, *, tight_output=True):
    instr_dim = packed["instr_dim"]
    state_dim = packed["state_dim"]
    latent_dim = packed["latent_dim"]
    lane = packed["lane"]
    w1i, w1s, w23, b_slab = packed["w1i"], packed["w1s"], packed["w23"], packed["b_slab"]

    # TODO(synk): _to_tensor_safe / _safe_reshape try-except host-side glue
    # (3-D mean reduction, truncate/pad-to-dim, error fallbacks) has no Pallas
    # equivalent; inputs here are assumed well-formed 1-D/2-D float arrays.
    if instr_emb.ndim == 1:
        instr_emb = instr_emb[None, :]
    if state_obs.ndim == 1:
        state_obs = state_obs[None, :]
    assert instr_emb.shape[-1] == instr_dim
    assert state_obs.shape[-1] == state_dim
    assert instr_emb.shape[0] == state_obs.shape[0]

    batch = instr_emb.shape[0]
    weight_bytes = 4 * (w1i.size + w1s.size + w23.size + b_slab.size)
    tile_b = _choose_tile_b(batch, instr_dim, state_dim, lane, weight_bytes)
    batch_pad = _round_up(batch, tile_b)

    xi = jnp.pad(instr_emb.astype(jnp.float32), ((0, batch_pad - batch), (0, 0)))
    xs = jnp.pad(state_obs.astype(jnp.float32), ((0, batch_pad - batch), (0, 0)))

    grid = (batch_pad // tile_b,)
    flops = 2 * batch_pad * lane * (instr_dim + state_dim + 2 * lane)
    bytes_accessed = 4 * (xi.size + xs.size + batch_pad * lane) + weight_bytes

    # Explicit VMEM limit: covers the activation tiles + resident weights with
    # slack; stays well under v7x's 64 MiB physical and v5e defaults.
    required = 2 * 4 * tile_b * (instr_dim + state_dim + lane) + 2 * weight_bytes
    vmem_limit = min(40 * 1024 * 1024, max(16 * 1024 * 1024, required + (4 << 20)))

    out = pl.pallas_call(
        _fusion_kernel,
        out_shape=jax.ShapeDtypeStruct((batch_pad, lane), jnp.float32),
        grid_spec=pltpu.PrefetchScalarGridSpec(
            num_scalar_prefetch=0,
            grid=grid,
            in_specs=[
                pl.BlockSpec((tile_b, instr_dim), lambda i: (i, 0)),   # activations: tiled
                pl.BlockSpec((tile_b, state_dim), lambda i: (i, 0)),
                pl.BlockSpec((instr_dim, lane), lambda i: (0, 0)),     # weights: resident
                pl.BlockSpec((state_dim, lane), lambda i: (0, 0)),
                pl.BlockSpec((2, lane, lane), lambda i: (0, 0, 0)),
                pl.BlockSpec((3, lane), lambda i: (0, 0)),             # biases: resident
            ],
            out_specs=pl.BlockSpec((tile_b, lane), lambda i: (i, 0)),
        ),
        compiler_params=pltpu.CompilerParams(
            dimension_semantics=("parallel",),       # batch tiles shard across v7x TCs
            vmem_limit_bytes=int(vmem_limit),
        ),
        cost_estimate=pl.CostEstimate(
            flops=flops, transcendentals=0, bytes_accessed=bytes_accessed),
    )(xi, xs, w1i, w1s, w23, b_slab)

    if tight_output:
        out = out[:batch, :latent_dim]
        # match `fused.squeeze(0) if fused.size(0) == 1 else fused`
        if batch == 1:
            out = jnp.squeeze(out, axis=0)
    return out


# ----------------------------------------------------------------------------
# Synthetic init (shapes match the nn.Linear layers, weights pre-transposed).
# ----------------------------------------------------------------------------
def init_params(instr_dim, state_dim, latent_dim, key):
    assert latent_dim % 2 == 0
    half = latent_dim // 2
    ks = jax.random.split(key, 6)

    def lin(k, fan_in, fan_out):
        bound = 1.0 / jnp.sqrt(fan_in)
        kw, kb = jax.random.split(k)
        w = jax.random.uniform(kw, (fan_in, fan_out), jnp.float32, -bound, bound)
        b = jax.random.uniform(kb, (1, fan_out), jnp.float32, -bound, bound)
        return w, b

    wi1, bi1 = lin(ks[0], instr_dim, half)
    wi2, bi2 = lin(ks[1], half, half)
    ws1, bs1 = lin(ks[2], state_dim, half)
    ws2, bs2 = lin(ks[3], half, half)
    wf1, bf1 = lin(ks[4], latent_dim, latent_dim)
    wf2, bf2 = lin(ks[5], latent_dim, latent_dim)

    return dict(
        wi1=wi1, bi1=bi1, wi2=wi2, bi2=bi2,
        ws1=ws1, bs1=bs1, ws2=ws2, bs2=bs2,
        wf1=wf1, bf1=bf1, wf2=wf2, bf2=bf2,
    )


def _reference(instr, state, p):
    """Pure-JAX reference on the original (unfolded) params."""
    h_i = jnp.maximum(instr @ p["wi1"] + p["bi1"], 0.0) @ p["wi2"] + p["bi2"]
    h_s = jnp.maximum(state @ p["ws1"] + p["bs1"], 0.0) @ p["ws2"] + p["bs2"]
    c = jnp.concatenate([h_i, h_s], axis=-1)
    out = jnp.maximum(c @ p["wf1"] + p["bf1"], 0.0) @ p["wf2"] + p["bf2"]
    return out


if __name__ == "__main__":
    instr_dim, state_dim, latent_dim = 32, 16, 64
    batch = 2

    key = jax.random.PRNGKey(0)
    k_params, k_instr, k_state = jax.random.split(key, 3)

    params = init_params(instr_dim, state_dim, latent_dim, k_params)
    packed = pack_params(params, instr_dim, state_dim, latent_dim)

    instr_emb = jax.random.normal(k_instr, (batch, instr_dim), jnp.float32)
    state_obs = jax.random.normal(k_state, (batch, state_dim), jnp.float32)

    out = dimension_aware_fusion(instr_emb, state_obs, packed)
    out = jax.block_until_ready(out)

    ref = _reference(instr_emb, state_obs, params)
    assert out.shape == (batch, latent_dim), out.shape
    # The layer-2 / fusion-1 fold is exact algebra; only f32 reassociation
    # noise (~1e-6) separates kernel from reference.
    assert jnp.allclose(out, ref, atol=5e-4, rtol=5e-4), "mismatch vs reference"

    print("KERNEL_OK")
</pallas_src>

<mosaic_0001>
module attributes {stable_mosaic.version = 11 : i64} {
  func.func @_fusion_kernel(%arg0: i32, %arg1: memref<8x32xf32, #tpu.memory_space<vmem>>, %arg2: memref<8x16xf32, #tpu.memory_space<vmem>>, %arg3: memref<32x128xf32, #tpu.memory_space<vmem>>, %arg4: memref<16x128xf32, #tpu.memory_space<vmem>>, %arg5: memref<2x128x128xf32, #tpu.memory_space<vmem>>, %arg6: memref<3x128xf32, #tpu.memory_space<vmem>>, %arg7: memref<8x128xf32, #tpu.memory_space<vmem>>) attributes {dimension_semantics = [#tpu.dimension_semantics<parallel>], iteration_bounds = array<i64: 1>, scalar_prefetch = 0 : i64, scratch_operands = 0 : i64, tpu.core_type = #tpu.core_type<tc>, window_params = [{transform_indices = @transform_0, window_bounds = array<i64: 8, 32>}, {transform_indices = @transform_1, window_bounds = array<i64: 8, 16>}, {pipeline_mode = #tpu.pipeline_mode<synchronous>, transform_indices = @transform_2, window_bounds = array<i64: 32, 128>}, {pipeline_mode = #tpu.pipeline_mode<synchronous>, transform_indices = @transform_3, window_bounds = array<i64: 16, 128>}, {pipeline_mode = #tpu.pipeline_mode<synchronous>, transform_indices = @transform_4, window_bounds = array<i64: 2, 128, 128>}, {pipeline_mode = #tpu.pipeline_mode<synchronous>, transform_indices = @transform_5, window_bounds = array<i64: 3, 128>}, {transform_indices = @transform_6, window_bounds = array<i64: 8, 128>}]} {
    %c0 = arith.constant 0 : index
    %c0_0 = arith.constant 0 : index
    %0 = vector.load %arg6[%c0, %c0_0] : memref<3x128xf32, #tpu.memory_space<vmem>>, vector<3x128xf32>
    %c0_1 = arith.constant 0 : index
    %c0_2 = arith.constant 0 : index
    %1 = vector.load %arg1[%c0_1, %c0_2] : memref<8x32xf32, #tpu.memory_space<vmem>>, vector<8x32xf32>
    %c0_3 = arith.constant 0 : index
    %c0_4 = arith.constant 0 : index
    %2 = vector.load %arg3[%c0_3, %c0_4] : memref<32x128xf32, #tpu.memory_space<vmem>>, vector<32x128xf32>
    %cst = arith.constant dense<0.000000e+00> : vector<8x128xf32>
    %3 = tpu.matmul %1, %2, %cst {dimension_numbers = #tpu.dot_dimension_numbers<[1], [0], [0], [1], [0, 0, 1, 1], [], []>} : vector<8x32xf32>, vector<32x128xf32>, vector<8x128xf32> -> vector<8x128xf32>
    %c0_5 = arith.constant 0 : index
    %c0_6 = arith.constant 0 : index
    %4 = vector.load %arg2[%c0_5, %c0_6] : memref<8x16xf32, #tpu.memory_space<vmem>>, vector<8x16xf32>
    %c0_7 = arith.constant 0 : index
    %c0_8 = arith.constant 0 : index
    %5 = vector.load %arg4[%c0_7, %c0_8] : memref<16x128xf32, #tpu.memory_space<vmem>>, vector<16x128xf32>
    %cst_9 = arith.constant dense<0.000000e+00> : vector<8x128xf32>
    %6 = tpu.matmul %4, %5, %cst_9 {dimension_numbers = #tpu.dot_dimension_numbers<[1], [0], [0], [1], [0, 0, 1, 1], [], []>} : vector<8x16xf32>, vector<16x128xf32>, vector<8x128xf32> -> vector<8x128xf32>
    %7 = arith.addf %3, %6 : vector<8x128xf32>
    %8 = vector.extract_strided_slice %0 {offsets = [0, 0], sizes = [1, 128], strides = [1, 1]} : vector<3x128xf32> to vector<1x128xf32>
    %9 = vector.broadcast %8 : vector<1x128xf32> to vector<8x128xf32>
    %10 = arith.addf %7, %9 : vector<8x128xf32>
    %cst_10 = arith.constant 0.000000e+00 : f32
    %11 = vector.broadcast %cst_10 : f32 to vector<8x128xf32>
    %12 = arith.maximumf %10, %11 : vector<8x128xf32>
    %c0_11 = arith.constant 0 : index
    %c0_12 = arith.constant 0 : index
    %c0_13 = arith.constant 0 : index
    %13 = vector.load %arg5[%c0_11, %c0_12, %c0_13] : memref<2x128x128xf32, #tpu.memory_space<vmem>>, vector<1x128x128xf32>
    %14 = vector.shape_cast %13 : vector<1x128x128xf32> to vector<128x128xf32>
    %cst_14 = arith.constant dense<0.000000e+00> : vector<8x128xf32>
    %15 = tpu.matmul %12, %14, %cst_14 {dimension_numbers = #tpu.dot_dimension_numbers<[1], [0], [0], [1], [0, 0, 1, 1], [], []>} : vector<8x128xf32>, vector<128x128xf32>, vector<8x128xf32> -> vector<8x128xf32>
    %16 = vector.extract_strided_slice %0 {offsets = [1, 0], sizes = [1, 128], strides = [1, 1]} : vector<3x128xf32> to vector<1x128xf32>
    %17 = vector.broadcast %16 : vector<1x128xf32> to vector<8x128xf32>
    %18 = arith.addf %15, %17 : vector<8x128xf32>
    %cst_15 = arith.constant 0.000000e+00 : f32
    %19 = vector.broadcast %cst_15 : f32 to vector<8x128xf32>
    %20 = arith.maximumf %18, %19 : vector<8x128xf32>
    %c1 = arith.constant 1 : index
    %c0_16 = arith.constant 0 : index
    %c0_17 = arith.constant 0 : index
    %21 = vector.load %arg5[%c1, %c0_16, %c0_17] : memref<2x128x128xf32, #tpu.memory_space<vmem>>, vector<1x128x128xf32>
    %22 = vector.shape_cast %21 : vector<1x128x128xf32> to vector<128x128xf32>
    %cst_18 = arith.constant dense<0.000000e+00> : vector<8x128xf32>
    %23 = tpu.matmul %20, %22, %cst_18 {dimension_numbers = #tpu.dot_dimension_numbers<[1], [0], [0], [1], [0, 0, 1, 1], [], []>} : vector<8x128xf32>, vector<128x128xf32>, vector<8x128xf32> -> vector<8x128xf32>
    %24 = vector.extract_strided_slice %0 {offsets = [2, 0], sizes = [1, 128], strides = [1, 1]} : vector<3x128xf32> to vector<1x128xf32>
    %25 = vector.broadcast %24 : vector<1x128xf32> to vector<8x128xf32>
    %26 = arith.addf %23, %25 : vector<8x128xf32>
    %c0_19 = arith.constant 0 : index
    %c0_20 = arith.constant 0 : index
    %27 = vector.load %arg7[%c0_19, %c0_20] : memref<8x128xf32, #tpu.memory_space<vmem>>, vector<8x128xf32>
    tpu.vector_store %arg7[%c0_19, %c0_20], %26 {strides = array<i32>} : memref<8x128xf32, #tpu.memory_space<vmem>>, vector<8x128xf32>,
    return
  }
  func.func @transform_0(%arg0: i32) -> (i32, i32) {
    %c0_i32 = arith.constant 0 : i32
    %c0_i32_0 = arith.constant 0 : i32
    return %arg0, %c0_i32 : i32, i32
  }
  func.func @transform_1(%arg0: i32) -> (i32, i32) {
    %c0_i32 = arith.constant 0 : i32
    %c0_i32_0 = arith.constant 0 : i32
    return %arg0, %c0_i32 : i32, i32
  }
  func.func @transform_2(%arg0: i32) -> (i32, i32) {
    %c0_i32 = arith.constant 0 : i32
    %c0_i32_0 = arith.constant 0 : i32
    %c0_i32_1 = arith.constant 0 : i32
    return %c0_i32, %c0_i32_0 : i32, i32
  }
  func.func @transform_3(%arg0: i32) -> (i32, i32) {
    %c0_i32 = arith.constant 0 : i32
    %c0_i32_0 = arith.constant 0 : i32
    %c0_i32_1 = arith.constant 0 : i32
    return %c0_i32, %c0_i32_0 : i32, i32
  }
  func.func @transform_4(%arg0: i32) -> (i32, i32, i32) {
    %c0_i32 = arith.constant 0 : i32
    %c0_i32_0 = arith.constant 0 : i32
    %c0_i32_1 = arith.constant 0 : i32
    %c0_i32_2 = arith.constant 0 : i32
    return %c0_i32, %c0_i32_0, %c0_i32_1 : i32, i32, i32
  }
  func.func @transform_5(%arg0: i32) -> (i32, i32) {
    %c0_i32 = arith.constant 0 : i32
    %c0_i32_0 = arith.constant 0 : i32
    %c0_i32_1 = arith.constant 0 : i32
    return %c0_i32, %c0_i32_0 : i32, i32
  }
  func.func @transform_6(%arg0: i32) -> (i32, i32) {
    %c0_i32 = arith.constant 0 : i32
    %c0_i32_0 = arith.constant 0 : i32
    return %arg0, %c0_i32 : i32, i32
  }
}

</mosaic_0001>

<bundles_post_ra>
// kernel: tpu_custom_call.1
= control target key start
LH: loop header
LB: loop body
LE: loop exit
PB: predicated region body
PF: predicated region fallthrough
CT: control target
= control target key end

     0   :  { %11 = vsyncpa [#allocation3], 0  ;;  %s944_s0 = inlined_call_operand.hbm [shape: f32[8,32], index: 0, kind: input, shape index: {}]   ;;  %s945_s1 = inlined_call_operand.hbm [shape: f32[8,16], index: 1, kind: input, shape index: {}]   ;;  %s946_s2 = inlined_call_operand.hbm [shape: f32[32,128], index: 2, kind: input, shape index: {}]   ;;  %s947_s3 = inlined_call_operand.hbm [shape: f32[16,128], index: 3, kind: input, shape index: {}]   ;;  %s948_s4 = inlined_call_operand.hbm [shape: f32[2,128,128], index: 4, kind: input, shape index: {}]   ;;  %s949_s5 = inlined_call_operand.vmem [shape: f32[3,128], index: 5, kind: input, shape index: {}]   ;;  %s950_s6 = inlined_call_operand.hbm [shape: f32[8,128], index: 6, kind: output, shape index: {}]  }
   0x1   :  { %12 = vsyncpa [#allocation6], 0 }
   0x2   :  { %13 = vsyncpa [#allocation9], 0 }
   0x3   :  { %14 = vsyncpa [#allocation4], 0  ;;  %s791_s21 = smov [#allocation5]   ;;  %s651_s25 = scalar_lea.hbm %s945_s1, 128 }
   0x4   :  { %s31_s22 = sshll.u32 %s791_s21, 4  ;;  %p652_p0 = scmp.ne.s32.totalorder %s945_s1, %s651_s25  ;;  %s32_s22 = int_to_ptr.vmem [resolvable:$true] %s31_s22 }
   0x5   :  { %p655_p1 = scmp.lt.u32.totalorder %s651_s25, %s945_s1 }
   0x7   :  { %p657_p2 = pnand %p655_p1, %p652_p0 }
   0x9   :  { %660 = shalt.err (!%p657_p2)
}
   0xa   :  { %s661_s30 = scalar_lea.vmem %s32_s22, 128  ;;  %p666_p4 = scmp.lt.s32.totalorder %s32_s22, %s32_s22 }
   0xb   :  { %p662_p3 = scmp.ne.s32.totalorder %s32_s22, %s661_s30  ;;  %p667_p5 = scmp.lt.s32.totalorder %s661_s30, %s661_s30 }
   0xd   :  { %p668_p6 = por %p667_p5, %p666_p4 }
   0xf   :  { %p669_p7 = pnand %p668_p6, %p662_p3 }
  0x11   :  { %672 = shalt.err (!%p669_p7)
}
  0x12   :  { %34 = dma.hbm_to_vmem [thread:$0]  %s945_s1, 128, %s32_s22, [#allocation6]  }
  0x13   :  { %s792_s9 = smov [#allocation8]   ;;  %s793_s11 = smov [#allocation2]  }
  0x14   :  { %s52_s10 = sshll.u32 %s792_s9, 4  ;;  %s21_s12 = sshll.u32 %s793_s11, 4  ;;  %s53_s10 = int_to_ptr.vmem [resolvable:$true] %s52_s10  ;;  %s22_s12 = int_to_ptr.vmem [resolvable:$true] %s21_s12 }
  0x15   :  { %s673_s15 = scalar_lea.hbm %s947_s3, 256 }
  0x16   :  { %p674_p8 = scmp.ne.s32.totalorder %s947_s3, %s673_s15  ;;  %p677_p9 = scmp.lt.u32.totalorder %s673_s15, %s947_s3 }
  0x18   :  { %p679_p10 = pnand %p677_p9, %p674_p8 }
  0x1a   :  { %682 = shalt.err (!%p679_p10)
}
  0x1b   :  { %s683_s1 = scalar_lea.vmem %s53_s10, 256  ;;  %p688_p12 = scmp.lt.s32.totalorder %s53_s10, %s53_s10 }
  0x1c   :  { %p684_p11 = scmp.ne.s32.totalorder %s53_s10, %s683_s1  ;;  %p689_p13 = scmp.lt.s32.totalorder %s683_s1, %s683_s1 }
  0x1e   :  { %p690_p0 = por %p689_p13, %p688_p12 }
  0x20   :  { %p691_p1 = pnand %p690_p0, %p684_p11 }
  0x22   :  { %694 = shalt.err (!%p691_p1)
}
  0x23   :  { %s794_s20 = smov 128   ;;  %s795_s21 = smov 8  }
  0x24   :  { %58 = dma.hbm_to_vmem [thread:$0]  %s947_s3, 256, %s53_s10, [#allocation9], %s794_s20, %s794_s20, %s795_s21  }
  0x25   :  { %s695_s26 = scalar_lea.hbm %s944_s0, 128 }
  0x26   :  { %p696_p2 = scmp.ne.s32.totalorder %s944_s0, %s695_s26  ;;  %p699_p3 = scmp.lt.u32.totalorder %s695_s26, %s944_s0 }
  0x28   :  { %p701_p4 = pnand %p699_p3, %p696_p2 }
  0x2a   :  { %704 = shalt.err (!%p701_p4)
}
  0x2b   :  { %s705_s7 = scalar_lea.vmem %s22_s12, 128  ;;  %p710_p6 = scmp.lt.s32.totalorder %s22_s12, %s22_s12 }
  0x2c   :  { %p706_p5 = scmp.ne.s32.totalorder %s22_s12, %s705_s7  ;;  %p711_p7 = scmp.lt.s32.totalorder %s705_s7, %s705_s7 }
  0x2e   :  { %p712_p8 = por %p711_p7, %p710_p6 }
  0x30   :  { %p713_p9 = pnand %p712_p8, %p706_p5 }
  0x32   :  { %716 = shalt.err (!%p713_p9)
}
  0x33   :  { %24 = dma.hbm_to_vmem [thread:$0]  %s944_s0, 128, %s22_s12, [#allocation3]  }
  0x34   :  { %s796_s9 = smov [#allocation7]   ;;  %s797_s11 = smov [#allocation10]  }
  0x35   :  { %s40_s10 = sshll.u32 %s796_s9, 4  ;;  %s64_s13 = sshll.u32 %s797_s11, 4  ;;  %s41_s10 = int_to_ptr.vmem [resolvable:$true] %s40_s10  ;;  %s65_s13 = int_to_ptr.vmem [resolvable:$true] %s64_s13 }
  0x36   :  { %s717_s16 = scalar_lea.hbm %s946_s2, 512 }
  0x37   :  { %p718_p10 = scmp.ne.s32.totalorder %s946_s2, %s717_s16  ;;  %p721_p11 = scmp.lt.u32.totalorder %s717_s16, %s946_s2 }
  0x39   :  { %p723_p12 = pnand %p721_p11, %p718_p10 }
  0x3b   :  { %726 = shalt.err (!%p723_p12)
}
  0x3c   :  { %s727_s0 = scalar_lea.vmem %s41_s10, 512  ;;  %p732_p0 = scmp.lt.s32.totalorder %s41_s10, %s41_s10 }
  0x3d   :  { %p728_p13 = scmp.ne.s32.totalorder %s41_s10, %s727_s0  ;;  %p733_p1 = scmp.lt.s32.totalorder %s727_s0, %s727_s0 }
  0x3f   :  { %p734_p2 = por %p733_p1, %p732_p0 }
  0x41   :  { %p735_p3 = pnand %p734_p2, %p728_p13 }
  0x43   :  { %738 = shalt.err (!%p735_p3)
}
  0x44   :  { %46 = dma.hbm_to_vmem [thread:$0]  %s946_s2, 512, %s41_s10, [#allocation6], %s794_s20, %s794_s20, %s795_s21  }
  0x45   :  { %s739_s25 = scalar_lea.hbm %s948_s4, 4096 }
  0x46   :  { %p740_p4 = scmp.ne.s32.totalorder %s948_s4, %s739_s25  ;;  %p743_p5 = scmp.lt.u32.totalorder %s739_s25, %s948_s4 }
  0x48   :  { %p745_p6 = pnand %p743_p5, %p740_p4 }
  0x4a   :  { %748 = shalt.err (!%p745_p6)
}
  0x4b   :  { %s749_s30 = scalar_lea.vmem %s65_s13, 4096  ;;  %p754_p8 = scmp.lt.s32.totalorder %s65_s13, %s65_s13 }
  0x4c   :  { %p750_p7 = scmp.ne.s32.totalorder %s65_s13, %s749_s30  ;;  %p755_p9 = scmp.lt.s32.totalorder %s749_s30, %s749_s30 }
  0x4e   :  { %p756_p10 = por %p755_p9, %p754_p8 }
  0x50   :  { %p757_p11 = pnand %p756_p10, %p750_p7 }
  0x52   :  { %760 = shalt.err (!%p757_p11)
}
  0x53   :  { %70 = dma.hbm_to_vmem [thread:$0]  %s948_s4, 4096, %s65_s13, [#allocation9], %s794_s20, %s794_s20, %s795_s21  }
  0x54   :  { %783 = dma.done.wait [#allocation3], 128  }
  0x55   :  { %784 = vsyncadd [#allocation3], 4294967168 }
  0x56   :  { %785 = dma.done.wait [#allocation6], 640  }
  0x57   :  { %786 = vsyncadd [#allocation6], 4294966656 }
  0x58   :  { %787 = dma.done.wait [#allocation9], 4352  }
  0x59   :  { %788 = vsyncadd [#allocation9], 4294962944  ;;  %v798_v0 = vmov 0.0|0.0   ;;  %vm799_vm0 = vmmov 0   ;;  %v800_v1 = vmov 0.0   ;;  %v90_v2 = vld [vmem:[#allocation7] sm:$0xff]  ;;  %v245_v58 = vlaneseq }
  0x5a   :  { %586 = vmatprep.subr.bf16.mxu1 %v798_v0  ;;  %583 = vmatprep.subr.bf16.mxu0 %v798_v0  ;;  %v91_v3 = vld [vmem:[#allocation7 + $0x8] sm:$0xff]  ;;  %v95_v4 = vld [vmem:[#allocation8] sm:$0xff]  ;;  %v92_v7 = vld [vmem:[#allocation7 + $0x10] sm:$0xff]  ;;  %vm97_vm1 = vcmask 130048   ;;  %vm171_vm2 = vcmask 261120  }
  0x5b   :  { %499 = vmatprep.mubr.msk.f32.mxu0 %vm799_vm0, %v800_v1  ;;  %510 = vmatprep.mubr.msk.f32.mxu1 %vm799_vm0, %v800_v1  ;;  %v587_v5 = vpack.c.bf16 %v91_v3, %v90_v2  ;;  %v96_v6 = vld [vmem:[#allocation8 + $0x8] sm:$0xff]  ;;  %v93_v8 = vld [vmem:[#allocation7 + $0x18] sm:$0xff]  ;;  %v251_v10 = vld [vmem:[#allocation10] sm:$0xff]  ;;  %v246_v59 = vshrl.u32 %v245_v58, 7 }
  0x5c   :  { %v584_v9 = vpack.c.bf16 %v96_v6, %v95_v4  ;;  %v590_v11 = vpack.c.bf16 %v93_v8, %v92_v7  ;;  %v252_v12 = vld [vmem:[#allocation10 + $0x8] sm:$0xff]  ;;  %v253_v15 = vld [vmem:[#allocation10 + $0x10] sm:$0xff]  ;;  %v254_v16 = vld [vmem:[#allocation10 + $0x18] sm:$0xff] }
  0x5d   :  { %588 = vmatpush3.bf16.msra.mxu1 %v587_v5  ;;  %v94_v13 = vld [vmem:[#allocation5] sm:$0xff]  ;;  %v593_v14 = vpack.c.bf16 %v252_v12, %v251_v10  ;;  %v89_v17 = vld [vmem:[#allocation2] sm:$0xff]  ;;  %v596_v18 = vpack.c.bf16 %v254_v16, %v253_v15  ;;  %v257_v22 = vld [vmem:[#allocation10 + $0x30] sm:$0xff]  ;;  %v247_v60 = vsub.s32 0, %v246_v59  ;;  %v361_v15 = vsub.s32 2, %v246_v59 }
  0x5e   :  { %585 = vmatpush3.bf16.msra.mxu0 %v584_v9  ;;  %589 = vmatprep.subr.bf16.mxu1 %v798_v0  ;;  %v255_v19 = vld [vmem:[#allocation10 + $0x20] sm:$0xff]  ;;  %v256_v20 = vld [vmem:[#allocation10 + $0x28] sm:$0xff]  ;;  %v258_v23 = vld [vmem:[#allocation10 + $0x38] sm:$0xff] }
  0x5f   :  { %592 = vmatprep.subr.bf16.mxu0 %v798_v0  ;;  %v599_v21 = vpack.c.bf16 %v256_v20, %v255_v19  ;;  %v602_v24 = vpack.c.bf16 %v258_v23, %v257_v22  ;;  %v259_v25 = vld [vmem:[#allocation10 + $0x40] sm:$0xff]  ;;  %v260_v26 = vld [vmem:[#allocation10 + $0x48] sm:$0xff]  ;;  %v261_v28 = vld [vmem:[#allocation10 + $0x50] sm:$0xff] }
  0x60   :  { %v605_v27 = vpack.c.bf16 %v260_v26, %v259_v25  ;;  %v262_v29 = vld [vmem:[#allocation10 + $0x58] sm:$0xff]  ;;  %v263_v31 = vld [vmem:[#allocation10 + $0x60] sm:$0xff]  ;;  %v264_v32 = vld [vmem:[#allocation10 + $0x68] sm:$0xff] }
  0x61   :  { %591 = vmatpush3.bf16.msra.mxu1 %v590_v11  ;;  %500 = vmatmul.mubr.msk.f32.vlgmr.msra.gmra.mrb[0].mxu0 %vm97_vm1, %v94_v13  ;;  %v608_v30 = vpack.c.bf16 %v262_v29, %v261_v28  ;;  %v611_v33 = vpack.c.bf16 %v264_v32, %v263_v31  ;;  %v265_v34 = vld [vmem:[#allocation10 + $0x70] sm:$0xff]  ;;  %v266_v35 = vld [vmem:[#allocation10 + $0x78] sm:$0xff]  ;;  %v343_v37 = vld [vmem:[#allocation10 + $0x80] sm:$0xff] }
  0x62   :  { %594 = vmatpush3.bf16.msra.mxu0 %v593_v14  ;;  %545 = vmatprep.mubr.msk.f32.mxu0 %vm799_vm0, %v800_v1  ;;  %v614_v36 = vpack.c.bf16 %v266_v35, %v265_v34  ;;  %v344_v38 = vld [vmem:[#allocation10 + $0x88] sm:$0xff]  ;;  %v345_v39 = vld [vmem:[#allocation10 + $0x90] sm:$0xff]  ;;  %v346_v41 = vld [vmem:[#allocation10 + $0x98] sm:$0xff] }
  0x63   :  { %595 = vmatprep.subr.bf16.mxu0 %v798_v0  ;;  %616 = vmatprep.subr.bf16.mxu1 %v798_v0  ;;  %v617_v40 = vpack.c.bf16 %v344_v38, %v343_v37  ;;  %v620_v42 = vpack.c.bf16 %v346_v41, %v345_v39  ;;  %v347_v43 = vld [vmem:[#allocation10 + $0xa0] sm:$0xff]  ;;  %v348_v44 = vld [vmem:[#allocation10 + $0xa8] sm:$0xff]  ;;  %v349_v46 = vld [vmem:[#allocation10 + $0xb0] sm:$0xff] }
  0x64   :  { %511 = vmatmul.mubr.msk.f32.vlgmr.msra.gmra.mrb[0].mxu1 %vm171_vm2, %v89_v17  ;;  %v623_v45 = vpack.c.bf16 %v348_v44, %v347_v43  ;;  %v350_v47 = vld [vmem:[#allocation10 + $0xb8] sm:$0xff]  ;;  %v351_v49 = vld [vmem:[#allocation10 + $0xc0] sm:$0xff]  ;;  %v352_v50 = vld [vmem:[#allocation10 + $0xc8] sm:$0xff] }
  0x65   :  { %580 = vmatprep.mubr.msk.f32.mxu1 %vm799_vm0, %v800_v1  ;;  %618 = vmatpush3.bf16.msra.mxu1 %v617_v40  ;;  %v626_v48 = vpack.c.bf16 %v350_v47, %v349_v46  ;;  %v629_v51 = vpack.c.bf16 %v352_v50, %v351_v49  ;;  %v353_v52 = vld [vmem:[#allocation10 + $0xd0] sm:$0xff]  ;;  %v354_v53 = vld [vmem:[#allocation10 + $0xd8] sm:$0xff]  ;;  %v355_v55 = vld [vmem:[#allocation10 + $0xe0] sm:$0xff] }
  0x66   :  { %597 = vmatpush3.bf16.msra.mxu0 %v596_v18  ;;  %619 = vmatprep.subr.bf16.mxu1 %v798_v0  ;;  %v632_v54 = vpack.c.bf16 %v354_v53, %v353_v52  ;;  %v356_v56 = vld [vmem:[#allocation10 + $0xe8] sm:$0xff]  ;;  %v88_v61 = vld [vmem:[%s949_s5] sm:$0x7]  ;;  %v357_v7 = vld [vmem:[#allocation10 + $0xf0] sm:$0xff]  ;;  %s801_s5 = smov [#allocation11]  }
  0x67   :  { %598 = vmatprep.subr.bf16.mxu0 %v798_v0  ;;  %v635_v57 = vpack.c.bf16 %v356_v56, %v355_v55  ;;  %v248_v1 = vrot.slane %v88_v61, %v247_v60  ;;  %v358_v8 = vld [vmem:[#allocation10 + $0xf8] sm:$0xff]  ;;  %v362_v16 = vrot.slane %v88_v61, %v361_v15  ;;  %s440_s21 = sshll.u32 %s801_s5, 4  ;;  %s441_s21 = int_to_ptr.vmem [resolvable:$true] %s440_s21 }
  0x68   :  { %v638_v9 = vpack.c.bf16 %v358_v8, %v357_v7  ;;  %s761_s3 = scalar_lea.vmem %s441_s21, 128  ;;  %p766_p13 = scmp.lt.s32.totalorder %s441_s21, %s441_s21 }
  0x69   :  { %621 = vmatpush3.bf16.msra.mxu1 %v620_v42  ;;  %p762_p12 = scmp.ne.s32.totalorder %s441_s21, %s761_s3  ;;  %p767_p0 = scmp.lt.s32.totalorder %s761_s3, %s761_s3 }
  0x6a   :  { %600 = vmatpush3.bf16.msra.mxu0 %v599_v21  ;;  %622 = vmatprep.subr.bf16.mxu1 %v798_v0 }
  0x6b   :  { %601 = vmatprep.subr.bf16.mxu0 %v798_v0  ;;  %p768_p1 = por %p767_p0, %p766_p13 }
  0x6d   :  { %624 = vmatpush3.bf16.msra.mxu1 %v623_v45  ;;  %p769_p2 = pnand %p768_p1, %p762_p12 }
  0x6e   :  { %603 = vmatpush3.bf16.msra.mxu0 %v602_v24  ;;  %625 = vmatprep.subr.bf16.mxu1 %v798_v0 }
  0x6f   :  { %604 = vmatprep.subr.bf16.mxu0 %v798_v0 }
  0x71   :  { %627 = vmatpush3.bf16.msra.mxu1 %v626_v48 }
  0x72   :  { %606 = vmatpush3.bf16.msra.mxu0 %v605_v27  ;;  %628 = vmatprep.subr.bf16.mxu1 %v798_v0 }
  0x73   :  { %607 = vmatprep.subr.bf16.mxu0 %v798_v0 }
  0x75   :  { %630 = vmatpush3.bf16.msra.mxu1 %v629_v51 }
  0x76   :  { %609 = vmatpush3.bf16.msra.mxu0 %v608_v30  ;;  %631 = vmatprep.subr.bf16.mxu1 %v798_v0 }
  0x77   :  { %610 = vmatprep.subr.bf16.mxu0 %v798_v0 }
  0x79   :  { %633 = vmatpush3.bf16.msra.mxu1 %v632_v54 }
  0x7a   :  { %612 = vmatpush3.bf16.msra.mxu0 %v611_v33  ;;  %634 = vmatprep.subr.bf16.mxu1 %v798_v0 }
  0x7b   :  { %613 = vmatprep.subr.bf16.mxu0 %v798_v0 }
  0x7d   :  { %636 = vmatpush3.bf16.msra.mxu1 %v635_v57 }
  0x7e   :  { %615 = vmatpush3.bf16.msra.mxu0 %v614_v36  ;;  %637 = vmatprep.subr.bf16.mxu1 %v798_v0  ;;  %v269_v0 = vsub.s32 1, %v246_v59 }
  0x80   :  { %v270_v10 = vrot.slane %v88_v61, %v269_v0 }
  0x81   :  { %639 = vmatpush3.bf16.msra.mxu1 %v638_v9 }
 0x134   :  { %v167_v62 = vpop.f32.mrb[0].mxu0 }
 0x135   :  { %v501_v63 = vpop.f32.mrb[1].mxu0 }
 0x137   :  { %v241_v2 = vpop.f32.mrb[0].mxu1 }
 0x138   :  { %v242_v3 = vadd.f32 %v241_v2, %v167_v62  ;;  %v512_v4 = vpop.f32.mrb[1].mxu1 }
 0x13a   :  { %v249_v5 = vadd.f32 %v248_v1, %v242_v3 }
 0x13c   :  { %v250_v6 = vmax.f32 %v249_v5, 0.0 }
 0x13e   :  { %546 = vmatmul.mubr.f32.vlgmr.msra.gmra.mrb[2].mxu0 %v250_v6 }
 0x211   :  { %v337_v11 = vpop.f32.mrb[2].mxu0 }
 0x212   :  { %v338_v12 = vadd.f32 %v337_v11, %v270_v10  ;;  %v547_v13 = vpop.f32.mrb[3].mxu0 }
 0x214   :  { %v341_v14 = vmax.f32 %v338_v12, 0.0 }
 0x216   :  { %581 = vmatmul.mubr.f32.vlgmr.msra.gmra.mrb[2].mxu1 %v341_v14 }
 0x2e9   :  { %v429_v17 = vpop.f32.mrb[2].mxu1 }
 0x2ea   :  { %v430_v18 = vadd.f32 %v429_v17, %v362_v16  ;;  %v582_v19 = vpop.f32.mrb[3].mxu1 }
 0x2ec   :  { %433 = vst [vmem:[#allocation11] sm:$0xff] %v430_v18 }
 0x2ed   :  { %772 = shalt.err (!%p769_p2)
}
 0x2ee   :  { %s773_s10 = scalar_lea.hbm %s950_s6, 128 }
 0x2ef   :  { %p774_p3 = scmp.ne.s32.totalorder %s950_s6, %s773_s10  ;;  %p777_p4 = scmp.lt.u32.totalorder %s773_s10, %s950_s6 }
 0x2f1   :  { %p779_p5 = pnand %p777_p4, %p774_p3 }
 0x2f3   :  { %782 = shalt.err (!%p779_p5)
}
 0x2f4   :  { %443 = dma.vmem_to_hbm [thread:$0]  %s441_s21, 128, %s950_s6, [#allocation4]  }
 0x2f5   :  { %789 = dma.done.wait [#allocation4], 128  }
 0x2f6   :  { %790 = vsyncadd [#allocation4], 4294967168 }
 0x2f7   :  { %447 = vsyncpa [#allocation3], 1 }
 0x2f8   :  { %448 = vsyncpa [#allocation6], 1 }
 0x2f9   :  { %449 = vsyncpa [#allocation9], 1 }
 0x2fa   :  { %450 = vsyncpa [#allocation4], 1 }

</bundles_post_ra>
